<compile_context>
chip_gen: v5e
topology: v5e:2x2
jax: 0.10.0
libtpu: 0.0.40
codegen_flags: <defaults>
</compile_context>

<pallas_src>
import jax
import jax.numpy as jnp
from jax.experimental import pallas as pl
from jax.experimental.pallas import tpu as pltpu

_LANE = 128
# Per-block VMEM budget. With double-buffered input + output blocks (4 buffers
# live) this stays well under the scoped-VMEM defaults on every generation
# (16 MiB v5e, 32 MiB v6e/v7x, and v7x's 64 MiB physical VMEM).
_BLOCK_BYTES = 2 * 1024 * 1024


def _copy_kernel(x_ref, o_ref):
    # Pure passthrough of the resident VMEM tile (full-width, unmasked stores
    # thanks to the lane-dense layout chosen by the wrapper).
    o_ref[...] = x_ref[...]


def _lane_dense_view(x):
    """Flatten to 2D with a lane-dense (multiple-of-128) last dim when possible."""
    total = x.size
    if total % _LANE == 0:
        cols = _LANE
        # Prefer wider lane-dense rows while keeping a sublane-friendly
        # (multiple-of-8) row count.
        for c in (2048, 1024, 512, 256, 128):
            if total % c == 0 and (total // c) % 8 == 0:
                cols = c
                break
        return x.reshape(total // cols, cols)
    # Fallback for non-128-divisible totals: single whole-array block only
    # (intended for small inputs).
    if x.ndim >= 2:
        return x.reshape(-1, x.shape[-1])
    return x.reshape(1, -1)


def _pallas_identity_copy(x):
    orig_shape = x.shape
    x2d = _lane_dense_view(x)
    rows, cols = x2d.shape
    itemsize = jnp.dtype(x.dtype).itemsize

    # Row-tile: as many rows as fit the per-block budget, rounded to a
    # multiple of 8 sublanes, capped at the full row count (small inputs end
    # up as a single full-array block, grid=(1,)).
    budget_rows = max(8, (_BLOCK_BYTES // (cols * itemsize)) // 8 * 8)
    tile_rows = min(rows, budget_rows)
    grid = (pl.cdiv(rows, tile_rows),)

    out2d = pl.pallas_call(
        _copy_kernel,
        out_shape=jax.ShapeDtypeStruct((rows, cols), x.dtype),
        grid=grid,
        in_specs=[pl.BlockSpec((tile_rows, cols), lambda i: (i, 0))],
        out_specs=pl.BlockSpec((tile_rows, cols), lambda i: (i, 0)),
        # Output aliases the input HBM buffer: no fresh allocation / writeback
        # when the caller donates; the copy stays purely DMA-bound.
        input_output_aliases={0: 0},
        compiler_params=pltpu.CompilerParams(
            # "parallel" lets Mosaic shard the row-tile axis across the two
            # TensorCores on v7x; harmless no-op on v5e/v6e.
            dimension_semantics=("parallel",)),
    )(x2d)
    return out2d.reshape(orig_shape)


def dummy_forward(x, materialize=False):
    """Identity forward matching Dummy.forward semantics (returns x).

    The fastest correct identity launches no kernel at all (default).
    Pass materialize=True to force a materialized Pallas copy if an explicit
    op boundary is desired.
    """
    # TODO(synk): updateObservers('input', x[0], 'tensorPIL') is a host-side
    # observer callback with no tensor-compute equivalent; omitted.
    if not materialize:
        return x
    return _pallas_identity_copy(x)


if __name__ == "__main__":
    key = jax.random.PRNGKey(0)
    # NCHW input consistent with an image-like tensor: batch=2, channels=4,
    # spatial=16x16.
    x = jax.random.normal(key, (2, 4, 16, 16), dtype=jnp.float32)
    x_host = jax.device_get(x)  # snapshot for comparison (kernel aliases input)

    # Default (recommended) path: pure identity, zero kernel overhead.
    y_fast = dummy_forward(x)
    assert y_fast.shape == x.shape and y_fast.dtype == x.dtype

    # Materialized Pallas copy path (exercises the kernel once).
    y = dummy_forward(x, materialize=True)
    jax.block_until_ready(y)

    assert y.shape == x.shape and y.dtype == x.dtype
    assert bool(jnp.allclose(y, x_host))
    print("KERNEL_OK")
</pallas_src>

<mosaic_0001>
module attributes {stable_mosaic.version = 11 : i64} {
  func.func @_copy_kernel(%arg0: i32, %arg1: memref<8x256xf32, #tpu.memory_space<vmem>>, %arg2: memref<8x256xf32, #tpu.memory_space<vmem>>) attributes {dimension_semantics = [#tpu.dimension_semantics<parallel>], iteration_bounds = array<i64: 1>, scalar_prefetch = 0 : i64, scratch_operands = 0 : i64, tpu.core_type = #tpu.core_type<tc>, window_params = [{transform_indices = @transform_0, window_bounds = array<i64: 8, 256>}, {transform_indices = @transform_1, window_bounds = array<i64: 8, 256>}]} {
    %c0 = arith.constant 0 : index
    %c0_0 = arith.constant 0 : index
    %0 = vector.load %arg1[%c0, %c0_0] : memref<8x256xf32, #tpu.memory_space<vmem>>, vector<8x256xf32>
    %c0_1 = arith.constant 0 : index
    %c0_2 = arith.constant 0 : index
    %1 = vector.load %arg2[%c0_1, %c0_2] : memref<8x256xf32, #tpu.memory_space<vmem>>, vector<8x256xf32>
    tpu.vector_store %arg2[%c0_1, %c0_2], %0 {strides = array<i32>} : memref<8x256xf32, #tpu.memory_space<vmem>>, vector<8x256xf32>,
    return
  }
  func.func @transform_0(%arg0: i32) -> (i32, i32) {
    %c0_i32 = arith.constant 0 : i32
    %c0_i32_0 = arith.constant 0 : i32
    return %arg0, %c0_i32 : i32, i32
  }
  func.func @transform_1(%arg0: i32) -> (i32, i32) {
    %c0_i32 = arith.constant 0 : i32
    %c0_i32_0 = arith.constant 0 : i32
    return %arg0, %c0_i32 : i32, i32
  }
}

</mosaic_0001>

<bundles_post_ra>
// kernel: tpu_custom_call.1
= control target key start
LH: loop header
LB: loop body
LE: loop exit
PB: predicated region body
PF: predicated region fallthrough
CT: control target
= control target key end

     0   :  { %6 = vsyncpa [#allocation3], 0  ;;  %s116_s0 = inlined_call_operand.hbm [shape: f32[8,256], index: 0, kind: input, shape index: {}, may-alias: {0,1}]   ;;  %s117_s1 = inlined_call_operand.hbm [shape: f32[8,256], index: 1, kind: output, shape index: {}, may-alias: {0,1}]  }
   0x1   :  { %7 = vsyncpa [#allocation4], 0  ;;  %s13_s8 = sshll.u32 %s116_s0, 4  ;;  %s98_s9 = smov [#allocation2]   ;;  %s14_s8 = int_to_ptr.hbm [resolvable:$true] %s13_s8 }
   0x2   :  { %s15_s10 = sshll.u32 %s98_s9, 4  ;;  %s16_s10 = int_to_ptr.vmem [resolvable:$true] %s15_s10 }
   0x3   :  { %18 = dma.hbm_to_vmem [thread:$0]  %s14_s8, 256, %s16_s10, [#allocation3]  }
   0x4   :  { %94 = dma.done.wait [#allocation3], 256  }
   0x5   :  { %95 = vsyncadd [#allocation3], 4294967040  ;;  %s99_s11 = smov [#allocation5]   ;;  %s34_s15 = sshll.u32 %s117_s1, 4  ;;  %v23_v0 = vld [vmem:[#allocation2] sm:$0xff]  ;;  %v24_v1 = vld [vmem:[#allocation2 + $0x8] sm:$0xff]  ;;  %s35_s15 = int_to_ptr.hbm [resolvable:$true] %s34_s15 }
   0x6   :  { %s32_s12 = sshll.u32 %s99_s11, 4  ;;  %25 = vst [vmem:[#allocation5] sm:$0xff] %v23_v0  ;;  %s33_s12 = int_to_ptr.vmem [resolvable:$true] %s32_s12 }
   0x7   :  { %26 = vst [vmem:[#allocation5 + $0x8] sm:$0xff] %v24_v1 }
   0x8   :  { %37 = dma.vmem_to_hbm [thread:$0]  %s33_s12, 256, %s35_s15, [#allocation4]  }
   0x9   :  { %96 = dma.done.wait [#allocation4], 256  }
   0xa   :  { %97 = vsyncadd [#allocation4], 4294967040 }
   0xb   :  { %42 = vsyncpa [#allocation3], 1 }
   0xc   :  { %43 = vsyncpa [#allocation4], 1 }

</bundles_post_ra>
